<compile_context>
chip_gen: v7x
topology: tpu7x:2x2x1
jax: 0.10.0
libtpu: 0.0.40
codegen_flags: <defaults>
</compile_context>

<pallas_src>
import functools

import jax
import jax.numpy as jnp
from jax.experimental import pallas as pl
from jax.experimental.pallas import tpu as pltpu


def _kd_loss_kernel(s_ref, t_ref, lbl_ref, o_ref, *, inv_T, alpha, inv_B):
    s = s_ref[...].astype(jnp.float32)      # [TB, C] student logits
    t = t_ref[...].astype(jnp.float32)      # [TB, C] teacher logits
    lbl = lbl_ref[...]                      # [TB, 1] int32 labels

    TB, C = s.shape

    # ---- student cross-entropy (label-indexed, no one-hot) ----------------
    s_max = jnp.max(s, axis=-1, keepdims=True)
    s_shift = s - s_max
    log_z = jnp.log(jnp.sum(jnp.exp(s_shift), axis=-1, keepdims=True))
    col = jax.lax.broadcasted_iota(jnp.int32, (TB, C), 1)
    s_at_lbl = jnp.sum(jnp.where(col == lbl, s, 0.0), axis=-1, keepdims=True)
    ce_partial = jnp.sum((s_max + log_z) - s_at_lbl)     # sum of per-row CE

    # ---- distillation KL term ---------------------------------------------
    # Reuse the student max for the tempered pass: max(s/T) = max(s)/T for T > 0.
    sT_shift = s_shift * inv_T
    log_zs = jnp.log(jnp.sum(jnp.exp(sT_shift), axis=-1, keepdims=True))
    p_log = sT_shift - log_zs                            # log_softmax(s/T)

    t_max = jnp.max(t, axis=-1, keepdims=True)
    tT_shift = (t - t_max) * inv_T
    exp_t = jnp.exp(tT_shift)
    zt = jnp.sum(exp_t, axis=-1, keepdims=True)
    q = exp_t / zt                                       # softmax(t/T)
    log_zt = jnp.log(zt)
    # q * (log_q - p_log) with log_q folded in (no separate [TB, C] log_q array).
    kl_partial = jnp.sum(q * (tT_shift - log_zt - p_log))

    partial = (alpha * kl_partial + (1.0 - alpha) * ce_partial) * inv_B
    # Lane-dense (8, 128) unmasked store of this tile's partial contribution.
    o_ref[...] = jnp.full(o_ref.shape, partial, jnp.float32)


def _choose_tb(B, C):
    """Pick a batch tile: multiple of 8, divides B, per-input f32 tile <= ~4 MiB."""
    if B % 8 != 0:
        return B  # single full-batch tile (block == full dim is always legal)
    target_rows = max(8, (4 * 1024 * 1024) // (4 * max(C, 1)))
    target_rows = (target_rows // 8) * 8
    tb = min(B, max(8, target_rows))
    while B % tb != 0:
        tb -= 8
    return max(tb, 8)


def kd_loss(student_logits, teacher_logits, labels, *, T=3.0, alpha=0.5):
    """KDLoss forward (training mode). Returns a scalar float32."""
    B, C = student_logits.shape

    # Lane-dense padding of the class axis when it is large and ragged.
    # Padded lanes hold -1e30 -> exp underflows to 0 -> they contribute nothing.
    if C > 128 and C % 128 != 0:
        Cp = ((C + 127) // 128) * 128
        pad = ((0, 0), (0, Cp - C))
        student_logits = jnp.pad(student_logits, pad, constant_values=-1e30)
        teacher_logits = jnp.pad(teacher_logits, pad, constant_values=-1e30)
        C = Cp

    labels2d = labels.astype(jnp.int32).reshape(B, 1)

    TB = _choose_tb(B, C)
    G = B // TB

    kernel = functools.partial(
        _kd_loss_kernel,
        inv_T=1.0 / float(T),
        alpha=float(alpha),
        inv_B=1.0 / float(B),
    )

    partials = pl.pallas_call(
        kernel,
        out_shape=jax.ShapeDtypeStruct((G, 8, 128), jnp.float32),
        grid=(G,),
        in_specs=[
            pl.BlockSpec((TB, C), lambda i: (i, 0)),
            pl.BlockSpec((TB, C), lambda i: (i, 0)),
            pl.BlockSpec((TB, 1), lambda i: (i, 0)),
        ],
        out_specs=pl.BlockSpec((1, 8, 128), lambda i: (i, 0, 0)),
        compiler_params=pltpu.CompilerParams(
            dimension_semantics=("parallel",),   # independent per-tile partials
            vmem_limit_bytes=64 * 1024 * 1024,
        ),
    )(student_logits, teacher_logits, labels2d)

    # Tiny final reduction over per-tile partials (already /B and alpha-blended).
    return jnp.sum(partials[:, 0, 0])


def _kd_loss_ref(student_logits, teacher_logits, labels, *, T=3.0, alpha=0.5):
    """Pure-JAX reference mirroring the PyTorch module."""
    B, C = student_logits.shape
    s = student_logits.astype(jnp.float32)
    t = teacher_logits.astype(jnp.float32)
    # student CrossEntropyLoss (mean over batch)
    log_p_full = jax.nn.log_softmax(s, axis=1)
    ce = -jnp.mean(jnp.take_along_axis(log_p_full, labels[:, None], axis=1))
    # KLDivLoss(reduction='batchmean')
    p = jax.nn.log_softmax(s / T, axis=1)
    q = jax.nn.softmax(t / T, axis=1)
    kl = jnp.sum(q * (jnp.log(q) - p)) / B
    return alpha * kl + (1.0 - alpha) * ce


if __name__ == "__main__":
    key = jax.random.PRNGKey(0)
    k1, k2, k3 = jax.random.split(key, 3)

    B, C = 8, 16  # batch, num_classes (small test shape)
    student_logits = jax.random.normal(k1, (B, C), dtype=jnp.float32)
    teacher_logits = jax.random.normal(k2, (B, C), dtype=jnp.float32)
    labels = jax.random.randint(k3, (B,), 0, C, dtype=jnp.int32)

    loss = kd_loss(student_logits, teacher_logits, labels, T=3.0, alpha=0.5)
    jax.block_until_ready(loss)

    ref = _kd_loss_ref(student_logits, teacher_logits, labels, T=3.0, alpha=0.5)
    assert jnp.allclose(loss, ref, rtol=1e-5, atol=1e-5), (loss, ref)

    print("KERNEL_OK")
</pallas_src>

<mosaic_0001>
module attributes {stable_mosaic.version = 11 : i64} {
  func.func @_kd_loss_kernel(%arg0: i32, %arg1: memref<8x16xf32, #tpu.memory_space<vmem>>, %arg2: memref<8x16xf32, #tpu.memory_space<vmem>>, %arg3: memref<8x1xi32, #tpu.memory_space<vmem>>, %arg4: memref<1x8x128xf32, #tpu.memory_space<vmem>>) attributes {dimension_semantics = [#tpu.dimension_semantics<parallel>], iteration_bounds = array<i64: 1>, scalar_prefetch = 0 : i64, scratch_operands = 0 : i64, tpu.core_type = #tpu.core_type<tc>, window_params = [{transform_indices = @transform_0, window_bounds = array<i64: 8, 16>}, {transform_indices = @transform_1, window_bounds = array<i64: 8, 16>}, {transform_indices = @transform_2, window_bounds = array<i64: 8, 1>}, {transform_indices = @transform_3, window_bounds = array<i64: 1, 8, 128>}]} {
    %c0 = arith.constant 0 : index
    %c0_0 = arith.constant 0 : index
    %0 = vector.load %arg1[%c0, %c0_0] : memref<8x16xf32, #tpu.memory_space<vmem>>, vector<8x16xf32>
    %c0_1 = arith.constant 0 : index
    %c0_2 = arith.constant 0 : index
    %1 = vector.load %arg2[%c0_1, %c0_2] : memref<8x16xf32, #tpu.memory_space<vmem>>, vector<8x16xf32>
    %c0_3 = arith.constant 0 : index
    %c0_4 = arith.constant 0 : index
    %2 = vector.load %arg3[%c0_3, %c0_4] : memref<8x1xi32, #tpu.memory_space<vmem>>, vector<8x1xi32>
    %cst = arith.constant dense<0xFF800000> : vector<8xf32>
    %3 = vector.multi_reduction <maximumf>, %0, %cst [1] : vector<8x16xf32> to vector<8xf32>
    %4 = vector.shape_cast %3 : vector<8xf32> to vector<8x1xf32>
    %5 = vector.broadcast %4 : vector<8x1xf32> to vector<8x16xf32>
    %6 = arith.subf %0, %5 : vector<8x16xf32>
    %7 = math.exp %6 : vector<8x16xf32>
    %cst_5 = arith.constant dense<0.000000e+00> : vector<8xf32>
    %8 = vector.multi_reduction <add>, %7, %cst_5 [1] : vector<8x16xf32> to vector<8xf32>
    %9 = vector.shape_cast %8 : vector<8xf32> to vector<8x1xf32>
    %10 = math.log %9 : vector<8x1xf32>
    %11 = tpu.iota {dimensions = array<i32: 1>} : vector<8x16xi32>
    %12 = vector.broadcast %2 : vector<8x1xi32> to vector<8x16xi32>
    %13 = arith.cmpi eq, %11, %12 : vector<8x16xi32>
    %cst_6 = arith.constant 0.000000e+00 : f32
    %14 = vector.broadcast %cst_6 : f32 to vector<8x16xf32>
    %15 = arith.select %13, %0, %14 : vector<8x16xi1>, vector<8x16xf32>
    %cst_7 = arith.constant dense<0.000000e+00> : vector<8xf32>
    %16 = vector.multi_reduction <add>, %15, %cst_7 [1] : vector<8x16xf32> to vector<8xf32>
    %17 = vector.shape_cast %16 : vector<8xf32> to vector<8x1xf32>
    %18 = arith.addf %4, %10 : vector<8x1xf32>
    %19 = arith.subf %18, %17 : vector<8x1xf32>
    %20 = vector.shape_cast %19 : vector<8x1xf32> to vector<1x8x1xf32>
    %cst_8 = arith.constant dense<0.000000e+00> : vector<1xf32>
    %21 = vector.multi_reduction <add>, %20, %cst_8 [1, 2] : vector<1x8x1xf32> to vector<1xf32>
    %22 = vector.shape_cast %21 : vector<1xf32> to vector<1x1x1xf32>
    %23 = vector.extract %22[0, 0, 0] : f32 from vector<1x1x1xf32>
    %cst_9 = arith.constant 0.333333343 : f32
    %24 = vector.broadcast %cst_9 : f32 to vector<8x16xf32>
    %25 = arith.mulf %6, %24 : vector<8x16xf32>
    %26 = math.exp %25 : vector<8x16xf32>
    %cst_10 = arith.constant dense<0.000000e+00> : vector<8xf32>
    %27 = vector.multi_reduction <add>, %26, %cst_10 [1] : vector<8x16xf32> to vector<8xf32>
    %28 = vector.shape_cast %27 : vector<8xf32> to vector<8x1xf32>
    %29 = math.log %28 : vector<8x1xf32>
    %30 = vector.broadcast %29 : vector<8x1xf32> to vector<8x16xf32>
    %31 = arith.subf %25, %30 : vector<8x16xf32>
    %cst_11 = arith.constant dense<0xFF800000> : vector<8xf32>
    %32 = vector.multi_reduction <maximumf>, %1, %cst_11 [1] : vector<8x16xf32> to vector<8xf32>
    %33 = vector.shape_cast %32 : vector<8xf32> to vector<8x1xf32>
    %34 = vector.broadcast %33 : vector<8x1xf32> to vector<8x16xf32>
    %35 = arith.subf %1, %34 : vector<8x16xf32>
    %cst_12 = arith.constant 0.333333343 : f32
    %36 = vector.broadcast %cst_12 : f32 to vector<8x16xf32>
    %37 = arith.mulf %35, %36 : vector<8x16xf32>
    %38 = math.exp %37 : vector<8x16xf32>
    %cst_13 = arith.constant dense<0.000000e+00> : vector<8xf32>
    %39 = vector.multi_reduction <add>, %38, %cst_13 [1] : vector<8x16xf32> to vector<8xf32>
    %40 = vector.shape_cast %39 : vector<8xf32> to vector<8x1xf32>
    %41 = vector.broadcast %40 : vector<8x1xf32> to vector<8x16xf32>
    %42 = arith.divf %38, %41 : vector<8x16xf32>
    %43 = math.log %40 : vector<8x1xf32>
    %44 = vector.broadcast %43 : vector<8x1xf32> to vector<8x16xf32>
    %45 = arith.subf %37, %44 : vector<8x16xf32>
    %46 = arith.subf %45, %31 : vector<8x16xf32>
    %47 = arith.mulf %42, %46 : vector<8x16xf32>
    %48 = vector.shape_cast %47 : vector<8x16xf32> to vector<1x8x16xf32>
    %cst_14 = arith.constant dense<0.000000e+00> : vector<1xf32>
    %49 = vector.multi_reduction <add>, %48, %cst_14 [1, 2] : vector<1x8x16xf32> to vector<1xf32>
    %50 = vector.shape_cast %49 : vector<1xf32> to vector<1x1x1xf32>
    %51 = vector.extract %50[0, 0, 0] : f32 from vector<1x1x1xf32>
    %cst_15 = arith.constant 5.000000e-01 : f32
    %52 = arith.mulf %cst_15, %51 : f32
    %cst_16 = arith.constant 5.000000e-01 : f32
    %53 = arith.mulf %cst_16, %23 : f32
    %54 = arith.addf %52, %53 : f32
    %cst_17 = arith.constant 1.250000e-01 : f32
    %55 = arith.mulf %54, %cst_17 : f32
    %56 = vector.broadcast %55 : f32 to vector<1x8x128xf32>
    %c0_18 = arith.constant 0 : index
    %c0_19 = arith.constant 0 : index
    %c0_20 = arith.constant 0 : index
    %57 = vector.load %arg4[%c0_18, %c0_19, %c0_20] : memref<1x8x128xf32, #tpu.memory_space<vmem>>, vector<1x8x128xf32>
    tpu.vector_store %arg4[%c0_18, %c0_19, %c0_20], %56 {strides = array<i32>} : memref<1x8x128xf32, #tpu.memory_space<vmem>>, vector<1x8x128xf32>,
    return
  }
  func.func @transform_0(%arg0: i32) -> (i32, i32) {
    %c0_i32 = arith.constant 0 : i32
    %c0_i32_0 = arith.constant 0 : i32
    return %arg0, %c0_i32 : i32, i32
  }
  func.func @transform_1(%arg0: i32) -> (i32, i32) {
    %c0_i32 = arith.constant 0 : i32
    %c0_i32_0 = arith.constant 0 : i32
    return %arg0, %c0_i32 : i32, i32
  }
  func.func @transform_2(%arg0: i32) -> (i32, i32) {
    %c0_i32 = arith.constant 0 : i32
    %c0_i32_0 = arith.constant 0 : i32
    return %arg0, %c0_i32 : i32, i32
  }
  func.func @transform_3(%arg0: i32) -> (i32, i32, i32) {
    %c0_i32 = arith.constant 0 : i32
    %c0_i32_0 = arith.constant 0 : i32
    %c0_i32_1 = arith.constant 0 : i32
    return %arg0, %c0_i32, %c0_i32_0 : i32, i32, i32
  }
}

</mosaic_0001>

<bundles_post_ra>
// kernel: tpu_custom_call.1
= control target key start
LH: loop header
LB: loop body
LE: loop exit
PB: predicated region body
PF: predicated region fallthrough
CT: control target
= control target key end

     0   :  { %8 = vsyncpa [#allocation3], 0  ;;  %s345_s0 = inlined_call_operand.hbm [shape: f32[8,16], index: 0, kind: input, shape index: {}]   ;;  %s346_s1 = inlined_call_operand.hbm [shape: f32[8,16], index: 1, kind: input, shape index: {}]   ;;  %s347_s2 = inlined_call_operand.hbm [shape: s32[8,1], index: 2, kind: input, shape index: {}]   ;;  %s348_s3 = inlined_call_operand.hbm [shape: f32[1,8,128], index: 3, kind: output, shape index: {}]  }
   0x1   :  { %9 = vsyncpa [#allocation6], 0 }
   0x2   :  { %10 = vsyncpa [#allocation4], 0  ;;  %s265_s12 = smov [#allocation5]   ;;  %s266_s14 = smov [#allocation2]  }
   0x3   :  { %s27_s13 = sshll.u32 %s265_s12, 4  ;;  %s17_s15 = sshll.u32 %s266_s14, 4  ;;  %s28_s13 = int_to_ptr.vmem [resolvable:$true] %s27_s13  ;;  %s18_s15 = int_to_ptr.vmem [resolvable:$true] %s17_s15 }
   0x4   :  { %s171_s18 = scalar_lea.hbm %s346_s1, 128 }
   0x5   :  { %p172_p0 = scmp.ne.s32.totalorder %s346_s1, %s171_s18  ;;  %p175_p1 = scmp.lt.u32.totalorder %s171_s18, %s346_s1 }
   0x7   :  { %p177_p2 = pnand %p175_p1, %p172_p0 }
   0x9   :  { %180 = shalt.err (!%p177_p2)
}
   0xa   :  { %s181_s23 = scalar_lea.vmem %s28_s13, 128  ;;  %p186_p4 = scmp.lt.s32.totalorder %s28_s13, %s28_s13 }
   0xb   :  { %p182_p3 = scmp.ne.s32.totalorder %s28_s13, %s181_s23  ;;  %p187_p5 = scmp.lt.s32.totalorder %s181_s23, %s181_s23 }
   0xd   :  { %p188_p6 = por %p187_p5, %p186_p4 }
   0xf   :  { %p189_p7 = pnand %p188_p6, %p182_p3 }
  0x11   :  { %192 = shalt.err (!%p189_p7)
}
  0x12   :  { %30 = dma.hbm_to_vmem [thread:$0]  %s346_s1, 128, %s28_s13, [#allocation6]  }
  0x13   :  { %s193_s28 = scalar_lea.hbm %s345_s0, 128 }
  0x14   :  { %p194_p8 = scmp.ne.s32.totalorder %s345_s0, %s193_s28  ;;  %p197_p9 = scmp.lt.u32.totalorder %s193_s28, %s345_s0 }
  0x16   :  { %p199_p10 = pnand %p197_p9, %p194_p8 }
  0x18   :  { %202 = shalt.err (!%p199_p10)
}
  0x19   :  { %s203_s6 = scalar_lea.vmem %s18_s15, 128  ;;  %p208_p12 = scmp.lt.s32.totalorder %s18_s15, %s18_s15 }
  0x1a   :  { %p204_p11 = scmp.ne.s32.totalorder %s18_s15, %s203_s6  ;;  %p209_p13 = scmp.lt.s32.totalorder %s203_s6, %s203_s6 }
  0x1c   :  { %p210_p0 = por %p209_p13, %p208_p12 }
  0x1e   :  { %p211_p1 = pnand %p210_p0, %p204_p11 }
  0x20   :  { %214 = shalt.err (!%p211_p1)
}
  0x21   :  { %20 = dma.hbm_to_vmem [thread:$0]  %s345_s0, 128, %s18_s15, [#allocation3]  }
  0x22   :  { %s267_s8 = smov [#allocation7]   ;;  %s215_s12 = scalar_lea.hbm %s347_s2, 128 }
  0x23   :  { %s37_s9 = sshll.u32 %s267_s8, 4  ;;  %p216_p2 = scmp.ne.s32.totalorder %s347_s2, %s215_s12  ;;  %s38_s9 = int_to_ptr.vmem [resolvable:$true] %s37_s9 }
  0x24   :  { %p219_p3 = scmp.lt.u32.totalorder %s215_s12, %s347_s2 }
  0x26   :  { %p221_p4 = pnand %p219_p3, %p216_p2 }
  0x28   :  { %224 = shalt.err (!%p221_p4)
}
  0x29   :  { %s225_s18 = scalar_lea.vmem %s38_s9, 128  ;;  %p230_p6 = scmp.lt.s32.totalorder %s38_s9, %s38_s9 }
  0x2a   :  { %p226_p5 = scmp.ne.s32.totalorder %s38_s9, %s225_s18  ;;  %p231_p7 = scmp.lt.s32.totalorder %s225_s18, %s225_s18 }
  0x2c   :  { %p232_p8 = por %p231_p7, %p230_p6 }
  0x2e   :  { %p233_p9 = pnand %p232_p8, %p226_p5 }
  0x30   :  { %236 = shalt.err (!%p233_p9)
}
  0x31   :  { %40 = dma.hbm_to_vmem [thread:$0]  %s347_s2, 128, %s38_s9, [#allocation6]  }
  0x32   :  { %259 = dma.done.wait [#allocation3], 128  }
  0x33   :  { %260 = vsyncadd [#allocation3], 4294967168 }
  0x34   :  { %261 = dma.done.wait [#allocation6], 256  }
  0x35   :  { %262 = vsyncadd [#allocation6], 4294967040  ;;  %v268_v0 = vmov 0   ;;  %vm53_vm0 = vcmask 130048   ;;  %v50_v1 = vld [vmem:[#allocation2] sm:$0xff]  ;;  %v51_v2 = vld [vmem:[#allocation5] sm:$0xff]  ;;  %v65_v15 = vlaneseq }
  0x36   :  { %155 = vset.pattern.permute.xlu1 %v268_v0  ;;  %156 = vset.pattern.permute.xlu0 %v268_v0  ;;  %v52_v3 = vld [vmem:[#allocation7] sm:$0xff]  ;;  %v54_v4 = vsel %vm53_vm0, %v50_v1, -inf  ;;  %v97_v5 = vsel %vm53_vm0, %v51_v2, -inf  ;;  %vm77_vm2 = vcmask 7168   ;;  %s269_s23 = smov [#allocation8]  }
  0x37   :  { %68 = vperm.xlu1 %155, %v52_v3   ;;  %55 = vmax.xlane.f32.xlu0 %v54_v4  ;;  %v66_v18 = vand.u32 127, %v65_v15  ;;  %s136_s24 = sshll.u32 %s269_s23, 4  ;;  %s137_s24 = int_to_ptr.vmem [resolvable:$true] %s136_s24 }
  0x38   :  { %s237_s26 = scalar_lea.vmem %s137_s24, 128  ;;  %p242_p11 = scmp.lt.s32.totalorder %s137_s24, %s137_s24 }
  0x39   :  { %p238_p10 = scmp.ne.s32.totalorder %s137_s24, %s237_s26  ;;  %p243_p12 = scmp.lt.s32.totalorder %s237_s26, %s237_s26 }
  0x3b   :  { %98 = vmax.xlane.f32.xlu0 %v97_v5  ;;  %p244_p13 = por %p243_p12, %p242_p11 }
  0x3d   :  { %p245_p0 = pnand %p244_p13, %p238_p10 }
  0xb6   :  { %v69_v19 = vpop.permute.xlu1 %68 }
  0xb7   :  { %vm70_vm1 = vcmp.eq.s32.totalorder %v66_v18, %v69_v19 }
  0xb8   :  { %v71_v23 = vsel %vm70_vm1, %v50_v1, 0.0 }
  0xb9   :  { %v72_v25 = vsel %vm53_vm0, %v71_v23, 0.0 }
  0xc4   :  { %v56_v6 = vpop.xlane.xlu0 %55 }
  0xc5   :  { %v57_v7 = vsub.f32 %v50_v1, %v56_v6 }
  0xc7   :  { %v88_v8 = vmul.f32 0.33333334, %v57_v7  ;;  %v58_v13 = vmul.f32 1.442695, %v57_v7 }
  0xc8   :  { %v99_v9 = vpop.xlane.xlu0 %98 }
  0xc9   :  { %v89_v10 = vmul.f32 1.442695, %v88_v8  ;;  %v100_v11 = vsub.f32 %v51_v2, %v99_v9 }
  0xcb   :  { %157 = vpow2.f32 %v89_v10  ;;  %v101_v12 = vmul.f32 0.33333334, %v100_v11 }
  0xcd   :  { %v102_v14 = vmul.f32 1.442695, %v101_v12 }
  0xcf   :  { %159 = vpow2.f32 %v102_v14 }
  0xd0   :  { %161 = vpow2.f32 %v58_v13 }
  0xd5   :  { %v158_v16 = vpop.eup %157 }
  0xd6   :  { %v91_v17 = vsel %vm53_vm0, %v158_v16, 0.0 }
  0xd7   :  { %92 = vadd.xlane.f32.xlu1 %v91_v17 }
  0xd9   :  { %v160_v20 = vpop.eup %159 }
  0xda   :  { %v104_v21 = vsel %vm53_vm0, %v160_v20, 0.0  ;;  %v162_v22 = vpop.eup %161 }
  0xdb   :  { %105 = vadd.xlane.f32.xlu0 %v104_v21  ;;  %v60_v24 = vsel %vm53_vm0, %v162_v22, 0.0 }
  0xdf   :  { %61 = vadd.xlane.f32.xlu0 %v60_v24 }
  0xe3   :  { %73 = vadd.xlane.f32.xlu0 %v72_v25 }
 0x164   :  { %v93_v26 = vpop.xlane.xlu1 %92 }
 0x165   :  { %163 = vlog2.f32 %v93_v26 }
 0x168   :  { %v106_v27 = vpop.xlane.xlu0 %105 }
 0x169   :  { %165 = vlog2.f32 %v106_v27 }
 0x16c   :  { %v62_v28 = vpop.xlane.xlu0 %61 }
 0x16d   :  { %167 = vlog2.f32 %v62_v28 }
 0x16e   :  { %169 = vrcp.f32 %v106_v27 }
 0x16f   :  { %v164_v29 = vpop.eup %163 }
 0x170   :  { %v95_v31 = vmul.f32 0.6931472, %v164_v29  ;;  %v74_v38 = vpop.xlane.xlu0 %73 }
 0x172   :  { %v96_v35 = vsub.f32 %v88_v8, %v95_v31 }
 0x173   :  { %v166_v30 = vpop.eup %165 }
 0x174   :  { %v110_v32 = vmul.f32 0.6931472, %v166_v30 }
 0x176   :  { %v111_v34 = vsub.f32 %v101_v12, %v110_v32 }
 0x177   :  { %v168_v33 = vpop.eup %167 }
 0x178   :  { %v64_v36 = vmul.f32 0.6931472, %v168_v33  ;;  %v170_v37 = vpop.eup %169  ;;  %v112_v40 = vsub.f32 %v111_v34, %v96_v35 }
 0x179   :  { %v108_v42 = vmul.f32 %v170_v37, %v160_v20 }
 0x17a   :  { %v75_v39 = vadd.f32 %v64_v36, %v56_v6 }
 0x17b   :  { %v113_v44 = vmul.f32 %v112_v40, %v108_v42 }
 0x17c   :  { %v76_v41 = vsub.f32 %v75_v39, %v74_v38 }
 0x17d   :  { %v114_v45 = vsel %vm53_vm0, %v113_v44, 0.0 }
 0x17e   :  { %v78_v43 = vsel %vm77_vm2, %v76_v41, 0.0 }
 0x17f   :  { %79 = vadd.xlane.f32.xlu0 %v78_v43 }
 0x183   :  { %115 = vadd.xlane.f32.xlu0 %v114_v45 }
 0x20c   :  { %v80_v46 = vpop.xlane.xlu0 %79 }
 0x20d   :  { %v81_v47 = vrot.slane %v80_v46, 4 }
 0x20f   :  { %v82_v48 = vadd.f32 %v81_v47, %v80_v46 }
 0x210   :  { %v116_v49 = vpop.xlane.xlu0 %115 }
 0x211   :  { %v83_v50 = vrot.slane %v82_v48, 2  ;;  %v117_v51 = vrot.slane %v116_v49, 4 }
 0x213   :  { %v118_v52 = vadd.f32 %v117_v51, %v116_v49  ;;  %v84_v53 = vadd.f32 %v83_v50, %v82_v48 }
 0x215   :  { %v119_v54 = vrot.slane %v118_v52, 2  ;;  %v85_v55 = vrot.slane %v84_v53, 1 }
 0x217   :  { %v120_v56 = vadd.f32 %v119_v54, %v118_v52  ;;  %v86_v57 = vadd.f32 %v85_v55, %v84_v53 }
 0x219   :  { %146 = vpush %v86_v57  ;;  %v121_v58 = vrot.slane %v120_v56, 1 }
 0x21b   :  { %v122_v59 = vadd.f32 %v121_v58, %v120_v56 }
 0x21d   :  { %148 = vpush %v122_v59 }
 0x24a   :  { %s147_s2 = spop %146 }
 0x24b   :  { %s125_s19 = smul.f32 0.5, %s147_s2 }
 0x24e   :  { %s149_s20 = spop %148 }
 0x24f   :  { %s124_s21 = smul.f32 0.5, %s149_s20 }
 0x251   :  { %s126_s22 = sadd.f32 %s125_s19, %s124_s21 }
 0x253   :  { %s127_s25 = smul.f32 0.125, %s126_s22 }
 0x255   :  { %v128_v60 = vstv %s127_s25 }
 0x256   :  { %129 = vst [vmem:[#allocation8] sm:$0xff] %v128_v60 }
 0x257   :  { %248 = shalt.err (!%p245_p0)
}
 0x258   :  { %s249_s29 = scalar_lea.hbm %s348_s3, 128 }
 0x259   :  { %p250_p1 = scmp.ne.s32.totalorder %s348_s3, %s249_s29  ;;  %p253_p2 = scmp.lt.u32.totalorder %s249_s29, %s348_s3 }
 0x25b   :  { %p255_p3 = pnand %p253_p2, %p250_p1 }
 0x25d   :  { %258 = shalt.err (!%p255_p3)
}
 0x25e   :  { %139 = dma.vmem_to_hbm [thread:$0]  %s137_s24, 128, %s348_s3, [#allocation4]  }
 0x25f   :  { %263 = dma.done.wait [#allocation4], 128  }
 0x260   :  { %264 = vsyncadd [#allocation4], 4294967168 }
 0x261   :  { %143 = vsyncpa [#allocation3], 1 }
 0x262   :  { %144 = vsyncpa [#allocation6], 1 }
 0x263   :  { %145 = vsyncpa [#allocation4], 1 }

</bundles_post_ra>
